<compile_context>
chip_gen: v7x
topology: tpu7x:2x2x1
jax: 0.10.0
libtpu: 0.0.40
codegen_flags: <defaults>
</compile_context>

<pallas_src>
import math
import functools

import jax
import jax.numpy as jnp
from jax.experimental import pallas as pl
from jax.experimental.pallas import tpu as pltpu


def _mha_kernel(x_ref, s_ref, m_ref,
                wq_ref, bq_ref, wkv_ref, bkv_ref, wp_ref, bp_ref,
                o_ref, *, n_heads, size):
    f32 = jnp.float32
    bf16 = jnp.bfloat16
    bt, tq, d = x_ref.shape
    tk = s_ref.shape[1]
    hd = n_heads * size

    x = x_ref[...].reshape(bt * tq, d)          # bf16
    s = s_ref[...].reshape(bt * tk, d)          # bf16
    keep = m_ref[...] != 0                      # (bt, tq, tk) bool, from int8 mask

    # Fused projections: heads packed along the output/lane axis; K and V share one
    # matmul.  bf16 operands, f32 accumulation.  1/sqrt(D) is already folded into wq/bq.
    q = (jnp.dot(x, wq_ref[...], preferred_element_type=f32)
         + bq_ref[...]).reshape(bt, tq, hd)                                # f32
    kv = (jnp.dot(s, wkv_ref[...], preferred_element_type=f32)
          + bkv_ref[...]).reshape(bt, tk, 2 * hd)                          # f32

    acc = jnp.zeros((bt * tq, size), f32)
    # Heads statically unrolled (H is tiny here).
    # TODO(synk): switch to lax.fori_loop + VMEM accumulator if n_heads grows.
    for h in range(n_heads):
        qh = q[:, :, h * size:(h + 1) * size]                              # f32
        kh = kv[:, :, h * size:(h + 1) * size]                             # f32
        vh = kv[:, :, hd + h * size: hd + (h + 1) * size].astype(bf16)

        # scores / softmax stay f32 (EUP/XLU bound regime; MXU is contraction-starved).
        scores = jnp.einsum("bqd,bkd->bqk", qh, kh, preferred_element_type=f32)
        # finite fill: fully-masked rows degrade to a uniform distribution, not NaN.
        scores = jnp.where(keep, scores, f32(-1e30))
        row_max = jnp.max(scores, axis=-1, keepdims=True)
        e = jnp.exp(scores - row_max)
        # exact divide (pl.reciprocal(approx=True) is a perf lever once tolerances allow)
        p = (e / jnp.sum(e, axis=-1, keepdims=True)).astype(bf16)

        ctx = jnp.einsum("bqk,bkd->bqd", p, vh, preferred_element_type=f32)  # (bt,tq,size)
        # Per-head slice of the output projection: no lane-axis head concat, ctx dies here.
        acc = acc + jnp.dot(ctx.reshape(bt * tq, size).astype(bf16),
                            wp_ref[h * size:(h + 1) * size, :],
                            preferred_element_type=f32)

    out = acc + bp_ref[...]
    o_ref[...] = out.reshape(bt, tq, size).astype(o_ref.dtype)


def multi_head_attention(x, states, mask, params, *, batch_block=None):
    """x: (B, Tq, D); states: (B, Tk, D); mask: (B, Tq, Tk), nonzero == keep."""
    B, Tq, D = x.shape
    Tk = states.shape[1]
    H = params["wq"].shape[0]
    HD = H * D
    scale = 1.0 / math.sqrt(D)
    f32, bf16 = jnp.float32, jnp.bfloat16

    # ---- one-time wrapper-side weight prep ------------------------------------------
    # PyTorch Linear stores (out, in); the kernel wants (in, H*out) so it does x @ W.
    def fuse(w):  # (H, D, D) -> (D, H*D); column block h equals w[h].T
        return jnp.transpose(w, (2, 0, 1)).reshape(D, HD)

    wq_t = (fuse(params["wq"]) * scale).astype(bf16)            # scale folded pre-cast
    bq_f = (params["bq"].reshape(1, HD) * scale).astype(f32)
    wkv_t = jnp.concatenate([fuse(params["wk"]), fuse(params["wv"])], axis=1).astype(bf16)
    bkv_f = jnp.concatenate([params["bk"].reshape(1, HD),
                             params["bv"].reshape(1, HD)], axis=1).astype(f32)
    wp_t = params["wp"].T.astype(bf16)                          # (H*D, D)
    bp_f = params["bp"].reshape(1, D).astype(f32)

    x_b = x.astype(bf16)
    s_b = states.astype(bf16)
    m_i8 = (mask != 0).astype(jnp.int8)      # compact mask; compare+select done in-kernel

    # Batch blocking: amortize ~0.35us/step overhead, but keep >= 2 grid steps so both
    # v7x TensorCores get work via the "parallel" axis.
    if batch_block is None:
        bt = 1
        for cand in range(min(8, max(1, B // 2)), 0, -1):
            if B % cand == 0:
                bt = cand
                break
    else:
        bt = batch_block
    assert B % bt == 0, "batch_block must divide the batch size"
    grid = (B // bt,)

    kernel = functools.partial(_mha_kernel, n_heads=H, size=D)

    def batch_spec(tail):
        return pl.BlockSpec((bt,) + tail, lambda b: (b, 0, 0))

    def const_spec(shape):                                      # grid-invariant block
        return pl.BlockSpec(shape, lambda b: (0, 0))

    return pl.pallas_call(
        kernel,
        out_shape=jax.ShapeDtypeStruct((B, Tq, D), x.dtype),
        grid=grid,
        in_specs=[
            batch_spec((Tq, D)),            # x        (bf16)
            batch_spec((Tk, D)),            # states   (bf16)
            batch_spec((Tq, Tk)),           # mask     (int8)
            const_spec((D, HD)),            # wq  (scaled, bf16)
            const_spec((1, HD)),            # bq  (scaled, f32)
            const_spec((D, 2 * HD)),        # w_kv     (bf16)
            const_spec((1, 2 * HD)),        # b_kv     (f32)
            const_spec((HD, D)),            # wp       (bf16)
            const_spec((1, D)),             # bp       (f32)
        ],
        out_specs=batch_spec((Tq, D)),
        compiler_params=pltpu.CompilerParams(
            dimension_semantics=("parallel",),
            vmem_limit_bytes=32 * 1024 * 1024,
        ),
    )(x_b, s_b, m_i8, wq_t, bq_f, wkv_t, bkv_f, wp_t, bp_f)


def init_params(key, size, n_heads):
    ks = jax.random.split(key, 8)
    std_h = math.sqrt(2.0 / (size + size))               # xavier_normal_ for (D, D)
    std_p = math.sqrt(2.0 / (size * n_heads + size))     # xavier_normal_ for (D, H*D)
    bbound = 1.0 / math.sqrt(size)                       # torch Linear default bias init
    pbound = 1.0 / math.sqrt(size * n_heads)

    wq = std_h * jax.random.normal(ks[0], (n_heads, size, size), jnp.float32)
    wk = std_h * jax.random.normal(ks[1], (n_heads, size, size), jnp.float32)
    wv = std_h * jax.random.normal(ks[2], (n_heads, size, size), jnp.float32)
    bq = jax.random.uniform(ks[3], (n_heads, size), jnp.float32, -bbound, bbound)
    bk = jax.random.uniform(ks[4], (n_heads, size), jnp.float32, -bbound, bbound)
    bv = jax.random.uniform(ks[5], (n_heads, size), jnp.float32, -bbound, bbound)
    wp = std_p * jax.random.normal(ks[6], (size, size * n_heads), jnp.float32)
    bp = jax.random.uniform(ks[7], (size,), jnp.float32, -pbound, pbound)
    return dict(wq=wq, bq=bq, wk=wk, bk=bk, wv=wv, bv=bv, wp=wp, bp=bp)


def reference(x, states, mask, params, precision=jax.lax.Precision.HIGHEST):
    """Pure-JAX mirror of the PyTorch MultiHeadAttention forward."""
    D = x.shape[-1]
    H = params["wq"].shape[0]
    outs = []
    for h in range(H):
        q = jnp.einsum("btd,od->bto", x, params["wq"][h], precision=precision) + params["bq"][h]
        k = jnp.einsum("bsd,od->bso", states, params["wk"][h], precision=precision) + params["bk"][h]
        v = jnp.einsum("bsd,od->bso", states, params["wv"][h], precision=precision) + params["bv"][h]
        scores = jnp.einsum("bqd,bkd->bqk", q, k, precision=precision) / math.sqrt(D)
        scores = jnp.where(mask == 0, -jnp.inf, scores)
        p = jax.nn.softmax(scores, axis=-1)
        outs.append(jnp.einsum("bqk,bkd->bqd", p, v, precision=precision))
    cat = jnp.concatenate(outs, axis=-1)
    return jnp.einsum("bqe,oe->bqo", cat, params["wp"], precision=precision) + params["bp"]


if __name__ == "__main__":
    B, Tq, Tk, D, H = 2, 8, 8, 32, 2

    key = jax.random.PRNGKey(0)
    kp, kx, ks = jax.random.split(key, 3)
    params = init_params(kp, D, H)

    x = jax.random.normal(kx, (B, Tq, D), jnp.float32)
    states = jax.random.normal(ks, (B, Tk, D), jnp.float32)
    # causal-style mask: every query row has at least one valid key (no all-NaN rows)
    mask = (jnp.arange(Tk)[None, :] <= jnp.arange(Tq)[:, None]).astype(jnp.int32)
    mask = jnp.broadcast_to(mask, (B, Tq, Tk))

    out = multi_head_attention(x, states, mask, params)
    out = jax.block_until_ready(out)
    assert out.shape == (B, Tq, D)
    assert bool(jnp.all(jnp.isfinite(out)))

    # Reference: exact f32 math on the same bf16-quantized activations/weights the
    # kernel consumes (biases stay f32 in both).  Tolerance covers the kernel's
    # remaining bf16 intermediate casts (softmax probs, context tiles).
    q16 = lambda t: t.astype(jnp.bfloat16).astype(jnp.float32)
    ref_params = dict(params)
    for name in ("wq", "wk", "wv", "wp"):
        ref_params[name] = q16(params[name])
    ref = reference(q16(x), q16(states), mask, ref_params)

    max_err = float(jnp.max(jnp.abs(out - ref)))
    assert jnp.allclose(out, ref, atol=3e-2, rtol=3e-2), (
        f"mismatch vs pure-JAX reference (max abs err = {max_err})")

    print("KERNEL_OK")
</pallas_src>

<mosaic_0001>
module attributes {stable_mosaic.version = 11 : i64} {
  func.func @_mha_kernel(%arg0: i32, %arg1: memref<1x8x32xbf16, #tpu.memory_space<vmem>>, %arg2: memref<1x8x32xbf16, #tpu.memory_space<vmem>>, %arg3: memref<1x8x8xi8, #tpu.memory_space<vmem>>, %arg4: memref<32x64xbf16, #tpu.memory_space<vmem>>, %arg5: memref<1x64xf32, #tpu.memory_space<vmem>>, %arg6: memref<32x128xbf16, #tpu.memory_space<vmem>>, %arg7: memref<1x128xf32, #tpu.memory_space<vmem>>, %arg8: memref<64x32xbf16, #tpu.memory_space<vmem>>, %arg9: memref<1x32xf32, #tpu.memory_space<vmem>>, %arg10: memref<1x8x32xf32, #tpu.memory_space<vmem>>) attributes {dimension_semantics = [#tpu.dimension_semantics<parallel>], iteration_bounds = array<i64: 2>, scalar_prefetch = 0 : i64, scratch_operands = 0 : i64, tpu.core_type = #tpu.core_type<tc>, window_params = [{transform_indices = @transform_0, window_bounds = array<i64: 1, 8, 32>}, {transform_indices = @transform_1, window_bounds = array<i64: 1, 8, 32>}, {transform_indices = @transform_2, window_bounds = array<i64: 1, 8, 8>}, {pipeline_mode = #tpu.pipeline_mode<synchronous>, transform_indices = @transform_3, window_bounds = array<i64: 32, 64>}, {pipeline_mode = #tpu.pipeline_mode<synchronous>, transform_indices = @transform_4, window_bounds = array<i64: 1, 64>}, {pipeline_mode = #tpu.pipeline_mode<synchronous>, transform_indices = @transform_5, window_bounds = array<i64: 32, 128>}, {pipeline_mode = #tpu.pipeline_mode<synchronous>, transform_indices = @transform_6, window_bounds = array<i64: 1, 128>}, {pipeline_mode = #tpu.pipeline_mode<synchronous>, transform_indices = @transform_7, window_bounds = array<i64: 64, 32>}, {pipeline_mode = #tpu.pipeline_mode<synchronous>, transform_indices = @transform_8, window_bounds = array<i64: 1, 32>}, {transform_indices = @transform_9, window_bounds = array<i64: 1, 8, 32>}]} {
    %c0 = arith.constant 0 : index
    %c0_0 = arith.constant 0 : index
    %c0_1 = arith.constant 0 : index
    %0 = vector.load %arg1[%c0, %c0_0, %c0_1] : memref<1x8x32xbf16, #tpu.memory_space<vmem>>, vector<1x8x32xbf16>
    %1 = vector.shape_cast %0 : vector<1x8x32xbf16> to vector<8x32xbf16>
    %c0_2 = arith.constant 0 : index
    %c0_3 = arith.constant 0 : index
    %c0_4 = arith.constant 0 : index
    %2 = vector.load %arg2[%c0_2, %c0_3, %c0_4] : memref<1x8x32xbf16, #tpu.memory_space<vmem>>, vector<1x8x32xbf16>
    %3 = vector.shape_cast %2 : vector<1x8x32xbf16> to vector<8x32xbf16>
    %c0_5 = arith.constant 0 : index
    %c0_6 = arith.constant 0 : index
    %c0_7 = arith.constant 0 : index
    %4 = vector.load %arg3[%c0_5, %c0_6, %c0_7] : memref<1x8x8xi8, #tpu.memory_space<vmem>>, vector<1x8x8xi8>
    %c0_i8 = arith.constant 0 : i8
    %5 = vector.broadcast %c0_i8 : i8 to vector<1x8x8xi8>
    %6 = arith.cmpi ne, %4, %5 : vector<1x8x8xi8>
    %c0_8 = arith.constant 0 : index
    %c0_9 = arith.constant 0 : index
    %7 = vector.load %arg4[%c0_8, %c0_9] : memref<32x64xbf16, #tpu.memory_space<vmem>>, vector<32x64xbf16>
    %cst = arith.constant dense<0.000000e+00> : vector<8x64xf32>
    %8 = tpu.matmul %1, %7, %cst {dimension_numbers = #tpu.dot_dimension_numbers<[1], [0], [0], [1], [0, 0, 1, 1], [], []>} : vector<8x32xbf16>, vector<32x64xbf16>, vector<8x64xf32> -> vector<8x64xf32>
    %c0_10 = arith.constant 0 : index
    %c0_11 = arith.constant 0 : index
    %9 = vector.load %arg5[%c0_10, %c0_11] : memref<1x64xf32, #tpu.memory_space<vmem>>, vector<1x64xf32>
    %10 = vector.broadcast %9 : vector<1x64xf32> to vector<8x64xf32>
    %11 = arith.addf %8, %10 : vector<8x64xf32>
    %12 = vector.shape_cast %11 : vector<8x64xf32> to vector<1x8x64xf32>
    %c0_12 = arith.constant 0 : index
    %c0_13 = arith.constant 0 : index
    %13 = vector.load %arg6[%c0_12, %c0_13] : memref<32x128xbf16, #tpu.memory_space<vmem>>, vector<32x128xbf16>
    %cst_14 = arith.constant dense<0.000000e+00> : vector<8x128xf32>
    %14 = tpu.matmul %3, %13, %cst_14 {dimension_numbers = #tpu.dot_dimension_numbers<[1], [0], [0], [1], [0, 0, 1, 1], [], []>} : vector<8x32xbf16>, vector<32x128xbf16>, vector<8x128xf32> -> vector<8x128xf32>
    %c0_15 = arith.constant 0 : index
    %c0_16 = arith.constant 0 : index
    %15 = vector.load %arg7[%c0_15, %c0_16] : memref<1x128xf32, #tpu.memory_space<vmem>>, vector<1x128xf32>
    %16 = vector.broadcast %15 : vector<1x128xf32> to vector<8x128xf32>
    %17 = arith.addf %14, %16 : vector<8x128xf32>
    %18 = vector.shape_cast %17 : vector<8x128xf32> to vector<1x8x128xf32>
    %cst_17 = arith.constant 0.000000e+00 : f32
    %19 = vector.broadcast %cst_17 : f32 to vector<8x32xf32>
    %20 = vector.extract_strided_slice %12 {offsets = [0, 0, 0], sizes = [1, 8, 32], strides = [1, 1, 1]} : vector<1x8x64xf32> to vector<1x8x32xf32>
    %21 = vector.extract_strided_slice %18 {offsets = [0, 0, 0], sizes = [1, 8, 32], strides = [1, 1, 1]} : vector<1x8x128xf32> to vector<1x8x32xf32>
    %22 = vector.extract_strided_slice %18 {offsets = [0, 0, 64], sizes = [1, 8, 32], strides = [1, 1, 1]} : vector<1x8x128xf32> to vector<1x8x32xf32>
    %23 = arith.truncf %22 : vector<1x8x32xf32> to vector<1x8x32xbf16>
    "tpu.trace_start"() <{level = 10 : i32, message = "bqd,bkd->bqk"}> : () -> ()
    %cst_18 = arith.constant dense<0.000000e+00> : vector<1x8x8xf32>
    %24 = tpu.matmul %20, %21, %cst_18 {dimension_numbers = #tpu.dot_dimension_numbers<[2], [2], [1], [1], [0, 0, 0, 1, 1, 1], [0], [0]>} : vector<1x8x32xf32>, vector<1x8x32xf32>, vector<1x8x8xf32> -> vector<1x8x8xf32>
    %cst_19 = arith.constant -1.000000e+30 : f32
    "tpu.trace_stop"() : () -> ()
    %25 = vector.broadcast %cst_19 : f32 to vector<1x8x8xf32>
    %26 = arith.select %6, %24, %25 : vector<1x8x8xi1>, vector<1x8x8xf32>
    %cst_20 = arith.constant dense<0xFF800000> : vector<1x8xf32>
    %27 = vector.multi_reduction <maximumf>, %26, %cst_20 [2] : vector<1x8x8xf32> to vector<1x8xf32>
    %28 = vector.shape_cast %27 : vector<1x8xf32> to vector<1x8x1xf32>
    %29 = vector.broadcast %28 : vector<1x8x1xf32> to vector<1x8x8xf32>
    %30 = arith.subf %26, %29 : vector<1x8x8xf32>
    %31 = math.exp %30 : vector<1x8x8xf32>
    %cst_21 = arith.constant dense<0.000000e+00> : vector<1x8xf32>
    %32 = vector.multi_reduction <add>, %31, %cst_21 [2] : vector<1x8x8xf32> to vector<1x8xf32>
    %33 = vector.shape_cast %32 : vector<1x8xf32> to vector<1x8x1xf32>
    %34 = vector.broadcast %33 : vector<1x8x1xf32> to vector<1x8x8xf32>
    %35 = arith.divf %31, %34 : vector<1x8x8xf32>
    %36 = arith.truncf %35 : vector<1x8x8xf32> to vector<1x8x8xbf16>
    "tpu.trace_start"() <{level = 10 : i32, message = "bqk,bkd->bqd"}> : () -> ()
    %cst_22 = arith.constant dense<0.000000e+00> : vector<1x8x32xf32>
    %37 = tpu.matmul %36, %23, %cst_22 {dimension_numbers = #tpu.dot_dimension_numbers<[2], [1], [1], [2], [0, 0, 0, 1, 1, 2], [0], [0]>} : vector<1x8x8xbf16>, vector<1x8x32xbf16>, vector<1x8x32xf32> -> vector<1x8x32xf32>
    "tpu.trace_stop"() : () -> ()
    %38 = vector.shape_cast %37 : vector<1x8x32xf32> to vector<8x32xf32>
    %39 = arith.truncf %38 : vector<8x32xf32> to vector<8x32xbf16>
    %c0_23 = arith.constant 0 : index
    %c0_24 = arith.constant 0 : index
    %40 = vector.load %arg8[%c0_23, %c0_24] : memref<64x32xbf16, #tpu.memory_space<vmem>>, vector<32x32xbf16>
    %cst_25 = arith.constant dense<0.000000e+00> : vector<8x32xf32>
    %41 = tpu.matmul %39, %40, %cst_25 {dimension_numbers = #tpu.dot_dimension_numbers<[1], [0], [0], [1], [0, 0, 1, 1], [], []>} : vector<8x32xbf16>, vector<32x32xbf16>, vector<8x32xf32> -> vector<8x32xf32>
    %42 = arith.addf %19, %41 : vector<8x32xf32>
    %43 = vector.extract_strided_slice %12 {offsets = [0, 0, 32], sizes = [1, 8, 32], strides = [1, 1, 1]} : vector<1x8x64xf32> to vector<1x8x32xf32>
    %44 = vector.extract_strided_slice %18 {offsets = [0, 0, 32], sizes = [1, 8, 32], strides = [1, 1, 1]} : vector<1x8x128xf32> to vector<1x8x32xf32>
    %45 = vector.extract_strided_slice %18 {offsets = [0, 0, 96], sizes = [1, 8, 32], strides = [1, 1, 1]} : vector<1x8x128xf32> to vector<1x8x32xf32>
    %46 = arith.truncf %45 : vector<1x8x32xf32> to vector<1x8x32xbf16>
    "tpu.trace_start"() <{level = 10 : i32, message = "bqd,bkd->bqk"}> : () -> ()
    %cst_26 = arith.constant dense<0.000000e+00> : vector<1x8x8xf32>
    %47 = tpu.matmul %43, %44, %cst_26 {dimension_numbers = #tpu.dot_dimension_numbers<[2], [2], [1], [1], [0, 0, 0, 1, 1, 1], [0], [0]>} : vector<1x8x32xf32>, vector<1x8x32xf32>, vector<1x8x8xf32> -> vector<1x8x8xf32>
    %cst_27 = arith.constant -1.000000e+30 : f32
    "tpu.trace_stop"() : () -> ()
    %48 = vector.broadcast %cst_27 : f32 to vector<1x8x8xf32>
    %49 = arith.select %6, %47, %48 : vector<1x8x8xi1>, vector<1x8x8xf32>
    %cst_28 = arith.constant dense<0xFF800000> : vector<1x8xf32>
    %50 = vector.multi_reduction <maximumf>, %49, %cst_28 [2] : vector<1x8x8xf32> to vector<1x8xf32>
    %51 = vector.shape_cast %50 : vector<1x8xf32> to vector<1x8x1xf32>
    %52 = vector.broadcast %51 : vector<1x8x1xf32> to vector<1x8x8xf32>
    %53 = arith.subf %49, %52 : vector<1x8x8xf32>
    %54 = math.exp %53 : vector<1x8x8xf32>
    %cst_29 = arith.constant dense<0.000000e+00> : vector<1x8xf32>
    %55 = vector.multi_reduction <add>, %54, %cst_29 [2] : vector<1x8x8xf32> to vector<1x8xf32>
    %56 = vector.shape_cast %55 : vector<1x8xf32> to vector<1x8x1xf32>
    %57 = vector.broadcast %56 : vector<1x8x1xf32> to vector<1x8x8xf32>
    %58 = arith.divf %54, %57 : vector<1x8x8xf32>
    %59 = arith.truncf %58 : vector<1x8x8xf32> to vector<1x8x8xbf16>
    "tpu.trace_start"() <{level = 10 : i32, message = "bqk,bkd->bqd"}> : () -> ()
    %cst_30 = arith.constant dense<0.000000e+00> : vector<1x8x32xf32>
    %60 = tpu.matmul %59, %46, %cst_30 {dimension_numbers = #tpu.dot_dimension_numbers<[2], [1], [1], [2], [0, 0, 0, 1, 1, 2], [0], [0]>} : vector<1x8x8xbf16>, vector<1x8x32xbf16>, vector<1x8x32xf32> -> vector<1x8x32xf32>
    "tpu.trace_stop"() : () -> ()
    %61 = vector.shape_cast %60 : vector<1x8x32xf32> to vector<8x32xf32>
    %62 = arith.truncf %61 : vector<8x32xf32> to vector<8x32xbf16>
    %c32 = arith.constant 32 : index
    %c0_31 = arith.constant 0 : index
    %63 = vector.load %arg8[%c32, %c0_31] : memref<64x32xbf16, #tpu.memory_space<vmem>>, vector<32x32xbf16>
    %cst_32 = arith.constant dense<0.000000e+00> : vector<8x32xf32>
    %64 = tpu.matmul %62, %63, %cst_32 {dimension_numbers = #tpu.dot_dimension_numbers<[1], [0], [0], [1], [0, 0, 1, 1], [], []>} : vector<8x32xbf16>, vector<32x32xbf16>, vector<8x32xf32> -> vector<8x32xf32>
    %65 = arith.addf %42, %64 : vector<8x32xf32>
    %c0_33 = arith.constant 0 : index
    %c0_34 = arith.constant 0 : index
    %66 = vector.load %arg9[%c0_33, %c0_34] : memref<1x32xf32, #tpu.memory_space<vmem>>, vector<1x32xf32>
    %67 = vector.broadcast %66 : vector<1x32xf32> to vector<8x32xf32>
    %68 = arith.addf %65, %67 : vector<8x32xf32>
    %69 = vector.shape_cast %68 : vector<8x32xf32> to vector<1x8x32xf32>
    %c0_35 = arith.constant 0 : index
    %c0_36 = arith.constant 0 : index
    %c0_37 = arith.constant 0 : index
    %70 = vector.load %arg10[%c0_35, %c0_36, %c0_37] : memref<1x8x32xf32, #tpu.memory_space<vmem>>, vector<1x8x32xf32>
    tpu.vector_store %arg10[%c0_35, %c0_36, %c0_37], %69 {strides = array<i32>} : memref<1x8x32xf32, #tpu.memory_space<vmem>>, vector<1x8x32xf32>,
    return
  }
  func.func @transform_0(%arg0: i32) -> (i32, i32, i32) {
    %c0_i32 = arith.constant 0 : i32
    %c0_i32_0 = arith.constant 0 : i32
    %c0_i32_1 = arith.constant 0 : i32
    return %arg0, %c0_i32, %c0_i32_0 : i32, i32, i32
  }
  func.func @transform_1(%arg0: i32) -> (i32, i32, i32) {
    %c0_i32 = arith.constant 0 : i32
    %c0_i32_0 = arith.constant 0 : i32
    %c0_i32_1 = arith.constant 0 : i32
    return %arg0, %c0_i32, %c0_i32_0 : i32, i32, i32
  }
  func.func @transform_2(%arg0: i32) -> (i32, i32, i32) {
    %c0_i32 = arith.constant 0 : i32
    %c0_i32_0 = arith.constant 0 : i32
    %c0_i32_1 = arith.constant 0 : i32
    return %arg0, %c0_i32, %c0_i32_0 : i32, i32, i32
  }
  func.func @transform_3(%arg0: i32) -> (i32, i32) {
    %c0_i32 = arith.constant 0 : i32
    %c0_i32_0 = arith.constant 0 : i32
    %c0_i32_1 = arith.constant 0 : i32
    return %c0_i32, %c0_i32_0 : i32, i32
  }
  func.func @transform_4(%arg0: i32) -> (i32, i32) {
    %c0_i32 = arith.constant 0 : i32
    %c0_i32_0 = arith.constant 0 : i32
    %c0_i32_1 = arith.constant 0 : i32
    return %c0_i32, %c0_i32_0 : i32, i32
  }
  func.func @transform_5(%arg0: i32) -> (i32, i32) {
    %c0_i32 = arith.constant 0 : i32
    %c0_i32_0 = arith.constant 0 : i32
    %c0_i32_1 = arith.constant 0 : i32
    return %c0_i32, %c0_i32_0 : i32, i32
  }
  func.func @transform_6(%arg0: i32) -> (i32, i32) {
    %c0_i32 = arith.constant 0 : i32
    %c0_i32_0 = arith.constant 0 : i32
    %c0_i32_1 = arith.constant 0 : i32
    return %c0_i32, %c0_i32_0 : i32, i32
  }
  func.func @transform_7(%arg0: i32) -> (i32, i32) {
    %c0_i32 = arith.constant 0 : i32
    %c0_i32_0 = arith.constant 0 : i32
    %c0_i32_1 = arith.constant 0 : i32
    return %c0_i32, %c0_i32_0 : i32, i32
  }
  func.func @transform_8(%arg0: i32) -> (i32, i32) {
    %c0_i32 = arith.constant 0 : i32
    %c0_i32_0 = arith.constant 0 : i32
    %c0_i32_1 = arith.constant 0 : i32
    return %c0_i32, %c0_i32_0 : i32, i32
  }
  func.func @transform_9(%arg0: i32) -> (i32, i32, i32) {
    %c0_i32 = arith.constant 0 : i32
    %c0_i32_0 = arith.constant 0 : i32
    %c0_i32_1 = arith.constant 0 : i32
    return %arg0, %c0_i32, %c0_i32_0 : i32, i32, i32
  }
}

</mosaic_0001>

<bundles_post_ra>
// kernel: tpu_custom_call.1
= control target key start
LH: loop header
LB: loop body
LE: loop exit
PB: predicated region body
PF: predicated region fallthrough
CT: control target
= control target key end

     0   :  { %14 = vsyncpa [#allocation3], 0  ;;  %s1488_s0 = inlined_call_operand.vmem [shape: bf16[2,8,32], index: 0, kind: input, shape index: {}]   ;;  %s1489_s1 = inlined_call_operand.vmem [shape: bf16[2,8,32], index: 1, kind: input, shape index: {}]   ;;  %s1490_s2 = inlined_call_operand.vmem [shape: s8[2,8,8], index: 2, kind: input, shape index: {}]   ;;  %s1491_s3 = inlined_call_operand.vmem [shape: bf16[32,64], index: 3, kind: input, shape index: {}]   ;;  %s1492_s4 = inlined_call_operand.vmem [shape: f32[1,64], index: 4, kind: input, shape index: {}]   ;;  %s1493_s5 = inlined_call_operand.vmem [shape: bf16[32,128], index: 5, kind: input, shape index: {}]   ;;  %s1494_s6 = inlined_call_operand.vmem [shape: f32[1,128], index: 6, kind: input, shape index: {}]   ;;  %s1495_s7 = inlined_call_operand.vmem [shape: bf16[64,32], index: 7, kind: input, shape index: {}]   ;;  %s1496_s8 = inlined_call_operand.vmem [shape: f32[1,32], index: 8, kind: input, shape index: {}]   ;;  %s1497_s9 = inlined_call_operand.hbm [shape: f32[2,8,32], index: 9, kind: output, shape index: {}]  }
   0x1   :  { %16 = vsyncpa [#allocation3 + $0x1], 0  ;;  %s1300_s30 = smov 0   ;;  %s1302_s10 = smov 0  }
   0x2   :  { %s1304_s11 = smov 0   ;;  %s1306_s12 = smov 0  }
   0x3 LB: > { %s1321_s13 = sadd.s32 4294967295, %s1241_s12   ;;  %s1011_s14 = sadd.s32 4294967294, %s1241_s12   ;;  %s1241_s12 = sphi %s1306_s12, %s1503_s12   ;;  %s1237_s11 = sphi %s1304_s11, %s1502_s11   ;;  %s1233_s10 = sphi %s1302_s10, %s1501_s10   ;;  %s1229_s30 = sphi %s1300_s30, %s1500_s30  }
   0x4   : > { %s1325_s15 = sadd.s32 1, %s1241_s12   ;;  %s233_s16 = sadd.s32 1, %s1237_s11 }
   0x5   : > { %s230_s17 = ssub.s32 %s1241_s12, %s1325_s15  ;;  %p243_p0 = scmp.ne.s32.totalorder %s1237_s11, %s1233_s10 }
   0x6   : > { %p231_p1 = scmp.eq.s32.totalorder %s230_s17, 0  ;;  %p244_p2 = scmp.eq.s32.totalorder %s1321_s13, 1 }
   0x7   : > { %p249_p3 = scmp.ne.s32.totalorder %s1233_s10, %s1229_s30  ;;  %p250_p4 = scmp.eq.s32.totalorder %s1011_s14, 1 }
   0x8   : > { %s1336_s18 = scalar_select %p231_p1, %s1237_s11, %s233_s16  }
   0x9   : > { %p1338_p5 = por %p244_p2, %p243_p0  ;;  %p1342_p6 = por %p250_p4, %p249_p3 }
   0xa   : > { %p1014_p7 = scmp.ge.s32.totalorder %s1241_s12, 1  ;;  %p307_p8 = scmp.lt.s32.totalorder %s1241_s12, 3 }
   0xc   : > { %p308_p9 = pnand %p1014_p7, %p307_p8 }
   0xd   : > { %v1163_v0 = vld [vmem:[%s1493_s5] sm:$0xff] (!%p308_p9)   ;;  %v1243_v1 = vmov (!%p308_p9), 0.0   ;;  %v1165_v3 = vld [vmem:[%s1493_s5 + $0x8] sm:$0xff] (!%p308_p9)   ;;  %vm1244_vm0 = vmmov (!%p308_p9), 0   ;;  %p350_p10 = scmp.lt.s32.totalorder (!%p308_p9), %s1321_s13, 1  ;;  %vm392_vm1 = vcmask (!%p308_p9), 261120  }
   0xe   : > { %311 = sbr.rel (%p308_p9) target bundleno = 1332 (0x534), region = 56  ;;  %1072 = vmatprep.subr.bf16.mxu1 (!%p308_p9), %v1243_v1  ;;  %1064 = vmatprep.subr.bf16.mxu0 (!%p308_p9), %v1243_v1  ;;  %v1164_v2 = vld [vmem:[%s1491_s3] sm:$0xff] (!%p308_p9)   ;;  %v1166_v4 = vld [vmem:[%s1491_s3 + $0x8] sm:$0xff] (!%p308_p9)   ;;  %v1246_v22 = vmov (!%p308_p9), 0   ;;  %vm583_vm4 = vcmask (!%p308_p9), 64512   ;;  %vm602_vm5 = vcmask (!%p308_p9), 1043456  }
   0xf   : > { %1073 = vmatpush3.bf16.msra.mxu1 (!%p308_p9), %v1163_v0  ;;  %1076 = vmatprep.mubr.msk.bf16.mxu1 (!%p308_p9), %vm1244_vm0, %v1243_v1  ;;  %v1023_v7 = vld [vmem:[%s1494_s6] ss:$0 sm:$0xff] (!%p308_p9)  ;;  %s1248_s23 = smov (!%p308_p9), 32   ;;  %v1169_v50 = vld [vmem:[%s1495_s7 + $0x10] sm:$0xff] (!%p308_p9)   ;;  %v1168_v58 = vld [vmem:[%s1495_s7 + $0x8] sm:$0xff] (!%p308_p9)   ;;  %s1249_s17 = smov (!%p308_p9), [#allocation2]  }
  0x10   : > { %1065 = vmatpush3.bf16.msra.mxu0 (!%p308_p9), %v1164_v2  ;;  %1074 = vmatprep.subr.bf16.mxu1 (!%p308_p9), %v1243_v1  ;;  %v1019_v8 = vld [vmem:[%s1492_s4] ss:$0 sm:$0xff] (!%p308_p9)  ;;  %v1170_v59 = vld [vmem:[%s1495_s7 + $0x18] sm:$0xff] (!%p308_p9)  }
  0x11   : > { %1066 = vmatprep.subr.bf16.mxu0 (!%p308_p9), %v1243_v1  ;;  %1068 = vmatprep.mubr.msk.bf16.mxu0 (!%p308_p9), %vm1244_vm0, %v1243_v1  ;;  %v1167_v56 = vld [vmem:[%s1495_s7] sm:$0xff] (!%p308_p9)  }
  0x13   : > { %1075 = vmatpush3.bf16.msra.mxu1 (!%p308_p9), %v1165_v3 }
  0x14   : > { %1067 = vmatpush3.bf16.msra.mxu0 (!%p308_p9), %v1166_v4  ;;  %1080 = vmatprep.subr.mxu1 (!%p308_p9), %v1243_v1 }
  0x15   : > { %s1368_s29 = scalar_select %p350_p10, %s1321_s13, 1  ;;  %1091 = vmatprep.subr.mxu0 %v1243_v1 }
  0x17   : > { %s1016_s14 = sshll.u32 %s1368_s29, 2  ;;  %s1018_s16 = sshll.u32 %s1368_s29, 1 }
  0x18   : > { %s357_s21 = scalar_lea.vmem %s1489_s1, %s1016_s14  ;;  %s353_s24 = scalar_lea.vmem %s1488_s0, %s1016_s14 }
  0x19   : > { %v366_v5 = vld [vmem:[%s357_s21] sm:$0xf]  ;;  %s1245_s14 = smov 96   ;;  %s361_s22 = scalar_lea.vmem %s1490_s2, %s1018_s16 }
  0x1a   : > { %v365_v6 = vld [vmem:[%s353_s24] sm:$0xf]  ;;  %1077 = vmatmul.mubr.msk.bf16.vlgmr.msra.gmra.mrb[0].mxu1 %vm392_vm1, %v366_v5  ;;  %s1247_s29 = smov 64   ;;  %s347_s21 = sand.u32 1, %s1233_s10  }
  0x1b   : > { %1069 = vmatmul.mubr.msk.bf16.vlgmr.msra.gmra.mrb[0].mxu0 %vm392_vm1, %v365_v6  ;;  %1082 = vmatprep.mubr.msk.f32.mxu1 %vm1244_vm0, %v1243_v1  ;;  %v367_v21 = vld [vmem:[%s361_s22] sm:$0x3]  ;;  %s1015_s22 = sshll.u32 %s347_s21, 3  ;;  %s1041_s24 = sshll.u32 %s1321_s13, 7 }
  0x1c   : > { %1093 = vmatprep.mubr.msk.f32.mxu0 %vm1244_vm0, %v1243_v1  ;;  %vm368_vm2 = vnez %v367_v21  ;;  %s349_s25 = scalar_lea.vmem [#allocation2], %s1015_s22  ;;  %s915_s13 = scalar_lea.sflag [#allocation3], %s347_s21 }
  0x1d   : > { %v579_v23 = vsel %vm368_vm2, 16843009, %v1246_v22  ;;  %s928_s26 = sshll.u32 %s349_s25, 4  ;;  %s1183_s22 = sshll.u32 %s1249_s17, 4  ;;  %s1447_s26 = int_to_ptr.vmem [resolvable:$true] %s928_s26  ;;  %s1184_s22 = int_to_ptr.vmem [resolvable:$false] %s1183_s22 }
  0x1e   : > { %v580_v24 = vunpack.c.0.s8 %v579_v23  ;;  %s1179_s16 = scalar_lea.vmem %s1447_s26, 128  ;;  %p1186_p0 = scmp.lt.s32.totalorder %s1447_s26, %s1184_s22 }
  0x1f   : > { %p1180_p11 = scmp.ne.s32.totalorder %s1447_s26, %s1179_s16 }
  0x20   : > { %vm581_vm3 = vcmp.ne.s32.totalorder %v580_v24, 0 }
  0x21   : > { %p1181_p12 = pnand %p1180_p11, %p1338_p5 }
  0x23   : > { %p1182_p13 = pneg %p1181_p12 }
  0xed   : > { %v496_v9 = vpop.f32.mrb[0].mxu1 }
  0xee   : > { %v497_v10 = vadd.f32 %v1023_v7, %v496_v9  ;;  %v1078_v11 = vpop.f32.mrb[1].mxu1  ;;  %v430_v12 = vpop.f32.mrb[0].mxu0 }
  0xef   : > { %v499_v13 = vpop.f32.mrb[2].mxu1  ;;  %v431_v14 = vadd.f32 %v1019_v8, %v430_v12  ;;  %v1070_v15 = vpop.f32.mrb[1].mxu0  ;;  %v1039_v11 = vld [vmem:[%s1496_s8] ss:$0 sm:$0xff] }
  0xf0   : > { %653 = vrot.lane.b32.xlu0 %v497_v10, %s1245_s14  ;;  %v1079_v16 = vpop.f32.mrb[3].mxu1  ;;  %1081 = vmatpush3.xpose.msk.msra.mxu1 %vm392_vm1, %v497_v10  ;;  %v433_v17 = vpop.f32.mrb[2].mxu0  ;;  %v502_v33 = vpack.c.bf16 %v497_v10, %v497_v10 }
  0xf1   : > { %v1071_v18 = vpop.f32.mrb[3].mxu0  ;;  %1085 = vmatprep.subr.bf16.mxu1 %v1243_v1 }
  0xf3   : > { %1083 = vmatmul.mubr.msk.f32.vlgmr.msra.gmra.mrb[4].mxu1 %vm392_vm1, %v431_v14 }
  0xf4   : > { %651 = vrot.lane.b32.xlu0 %v431_v14, %s1245_s14  ;;  %1087 = vmatprep.mubr.msk.bf16.mxu1 %vm1244_vm0, %v1243_v1  ;;  %s1445_s14 = scalar_lea.hbm %s1497_s9, %s1041_s24 }
 0x162   : > { %v654_v19 = vpop.permute.xlu0 %653 }
 0x163   : > { %1092 = vmatpush3.xpose.msk.msra.mxu0 %vm392_vm1, %v654_v19 }
 0x164   : > { %1096 = vmatprep.subr.bf16.mxu0 %v1243_v1 }
 0x166   : > { %v652_v20 = vpop.permute.xlu0 %651 }
 0x167   : > { %1094 = vmatmul.mubr.msk.f32.vlgmr.msra.gmra.mrb[4].mxu0 %vm392_vm1, %v652_v20 }
 0x168   : > { %1098 = vmatprep.mubr.msk.bf16.mxu0 %vm1244_vm0, %v1243_v1 }
 0x1c6   : > { %v575_v25 = vpop.f32.mrb[4].mxu1 }
 0x1c7   : > { %v582_v26 = vsel %vm581_vm3, %v575_v25, -1e+30  ;;  %v1084_v27 = vpop.f32.mrb[5].mxu1 }
 0x1c8   : > { %v584_v28 = vsel %vm583_vm4, %v582_v26, -inf }
 0x1c9   : > { %585 = vmax.xlane.f32.xlu1 %v584_v28 }
 0x23a   : > { %v725_v29 = vpop.f32.mrb[4].mxu0 }
 0x23b   : > { %v729_v30 = vsel %vm581_vm3, %v725_v29, -1e+30  ;;  %v1095_v31 = vpop.f32.mrb[5].mxu0 }
 0x23c   : > { %v730_v32 = vsel %vm583_vm4, %v729_v30, -inf }
 0x23d   : > { %731 = vmax.xlane.f32.xlu1 %v730_v32 }
 0x24e   : > { %597 = vrot.lane.b32.xlu1 %v502_v33, %s1247_s29  ;;  %s1185_s29 = scalar_lea.vmem %s1184_s22, 256 }
 0x24f   : > { %p1187_p1 = scmp.lt.s32.totalorder %s1185_s29, %s1179_s16 }
 0x251   : > { %p1188_p2 = por %p1187_p1, %p1186_p0 }
 0x253   : > { %p1189_p3 = pnand %p1188_p2, %p1182_p13 }
 0x256   : > { %v586_v34 = vpop.xlane.xlu1 %585 }
 0x257   : > { %v587_v35 = vsub.f32 %v582_v26, %v586_v34 }
 0x259   : > { %v588_v36 = vmul.f32 1.442695, %v587_v35 }
 0x25b   : > { %1171 = vpow2.f32 %v588_v36 }
 0x265   : > { %v1172_v37 = vpop.eup %1171 }
 0x266   : > { %v590_v38 = vsel %vm583_vm4, %v1172_v37, 0.0 }
 0x267   : > { %591 = vadd.xlane.f32.xlu0 %v590_v38 }
 0x2ca   : > { %v732_v39 = vpop.xlane.xlu1 %731 }
 0x2cb   : > { %v733_v40 = vsub.f32 %v729_v30, %v732_v39 }
 0x2cd   : > { %v734_v41 = vmul.f32 1.442695, %v733_v40 }
 0x2ce   : > { %v598_v42 = vpop.permute.xlu1 %597 }
 0x2cf   : > { %1173 = vpow2.f32 %v734_v41  ;;  %v604_v43 = vsel %vm602_vm5, %v598_v42, 0 }
 0x2d0   : > { %1086 = vmatpush3.bf16.msra.mxu1 %v604_v43 }
 0x2d1   : > { %1102 = vmatprep.subr.bf16.mxu1 %v1243_v1 }
 0x2d9   : > { %v1174_v44 = vpop.eup %1173 }
 0x2da   : > { %v736_v45 = vsel %vm583_vm4, %v1174_v44, 0.0 }
 0x2db   : > { %737 = vadd.xlane.f32.xlu1 %v736_v45 }
 0x2ec   : > { %742 = vrot.lane.b32.xlu1 %v502_v33, %s1248_s23 }
 0x2f4   : > { %v592_v46 = vpop.xlane.xlu0 %591 }
 0x2f5   : > { %1175 = vrcp.f32 %v592_v46 }
 0x2ff   : > { %v1176_v47 = vpop.eup %1175 }
 0x300   : > { %v594_v48 = vmul.f32 %v1176_v47, %v1172_v37 }
 0x302   : > { %v595_v49 = vpack.c.bf16 %v594_v48, %v594_v48 }
 0x304   : > { %1088 = vmatmul.mubr.msk.bf16.vlgmr.msra.gmra.mrb[8].mxu1 %vm583_vm4, %v595_v49 }
 0x305   : > { %1106 = vmatprep.mubr.msk.bf16.mxu1 %vm1244_vm0, %v1243_v1  ;;  %1103 = vmatpush3.bf16.msra.mxu1 %v1169_v50 }
 0x306   : > { %1104 = vmatprep.subr.bf16.mxu1 %v1243_v1 }
 0x309   : > { %1105 = vmatpush3.bf16.msra.mxu1 %v1170_v59 }
 0x368   : > { %v738_v51 = vpop.xlane.xlu1 %737 }
 0x369   : > { %1177 = vrcp.f32 %v738_v51 }
 0x36c   : > { %v743_v52 = vpop.permute.xlu1 %742 }
 0x36d   : > { %v748_v53 = vsel %vm602_vm5, %v743_v52, 0 }
 0x36e   : > { %1097 = vmatpush3.bf16.msra.mxu0 %v748_v53 }
 0x36f   : > { %1110 = vmatprep.subr.bf16.mxu0 %v1243_v1 }
 0x373   : > { %v1178_v54 = vpop.eup %1177 }
 0x374   : > { %v740_v55 = vmul.f32 %v1178_v54, %v1174_v44 }
 0x376   : > { %v741_v57 = vpack.c.bf16 %v740_v55, %v740_v55 }
 0x378   : > { %1099 = vmatmul.mubr.msk.bf16.vlgmr.msra.gmra.mrb[8].mxu0 %vm583_vm4, %v741_v57 }
 0x379   : > { %1111 = vmatpush3.bf16.msra.mxu0 %v1167_v56  ;;  %1114 = vmatprep.mubr.msk.bf16.mxu0 %vm1244_vm0, %v1243_v1 }
 0x37a   : > { %1112 = vmatprep.subr.bf16.mxu0 %v1243_v1 }
 0x37d   : > { %1113 = vmatpush3.bf16.msra.mxu0 %v1168_v58 }
 0x3d7   : > { %v640_v60 = vpop.f32.mrb[8].mxu1 }
 0x3d8   : > { %v646_v61 = vpack.c.bf16 %v640_v60, %v640_v60  ;;  %v1089_v62 = vpop.f32.mrb[9].mxu1 }
 0x3d9   : > { %v643_v63 = vpop.f32.mrb[10].mxu1 }
 0x3da   : > { %v1090_v0 = vpop.f32.mrb[11].mxu1  ;;  %1115 = vmatmul.mubr.msk.bf16.vlgmr.msra.gmra.mrb[12].mxu0 %vm392_vm1, %v646_v61 }
 0x44b   : > { %v784_v2 = vpop.f32.mrb[8].mxu0 }
 0x44c   : > { %v790_v3 = vpack.c.bf16 %v784_v2, %v784_v2  ;;  %v1100_v4 = vpop.f32.mrb[9].mxu0 }
 0x44d   : > { %v787_v5 = vpop.f32.mrb[10].mxu0 }
 0x44e   : > { %v1101_v1 = vpop.f32.mrb[11].mxu0  ;;  %1107 = vmatmul.mubr.msk.bf16.vlgmr.msra.gmra.mrb[12].mxu1 %vm392_vm1, %v790_v3 }
 0x4ad   : > { %v899_v6 = vpop.f32.mrb[12].mxu0 }
 0x4ae   : > { %v1116_v7 = vpop.f32.mrb[13].mxu0 }
 0x4af   : > { %v902_v8 = vpop.f32.mrb[14].mxu0 }
 0x4b0   : > { %v1117_v9 = vpop.f32.mrb[15].mxu0 }
 0x521   : > { %v844_v10 = vpop.f32.mrb[12].mxu1 }
 0x522   : > { %v900_v12 = vadd.f32 %v899_v6, %v844_v10  ;;  %v1108_v13 = vpop.f32.mrb[13].mxu1 }
 0x523   : > { %v847_v14 = vpop.f32.mrb[14].mxu1 }
 0x524   : > { %v912_v15 = vadd.f32 %v1039_v11, %v900_v12  ;;  %v1109_v16 = vpop.f32.mrb[15].mxu1 }
 0x526   : > { %913 = vst.msk [vmem:[%s349_s25] sm:$0xff] %vm392_vm1, %v912_v15 }
 0x527   : > { %1192 = shalt.err (!%p1189_p3)
}
 0x528   : > { %s1193_s21 = scalar_lea.hbm %s1445_s14, 128  ;;  %s1197_s25 = scalar_lea.hbm %s1497_s9, 256 }
 0x529   : > { %p1194_p4 = scmp.ne.s32.totalorder %s1445_s14, %s1193_s21  ;;  %p1198_p9 = scmp.lt.u32.totalorder %s1445_s14, %s1497_s9 }
 0x52a   : > { %p1199_p10 = scmp.lt.u32.totalorder %s1197_s25, %s1193_s21  ;;  %p1201_p12 = scmp.lt.u32.totalorder %s1193_s21, %s1445_s14 }
 0x52b   : > { %p1195_p7 = pnand %p1194_p4, %p1338_p5 }
 0x52c   : > { %p1200_p11 = por %p1199_p10, %p1198_p9 }
 0x52d   : > { %p1196_p8 = pneg %p1195_p7 }
 0x52e   : > { %p1202_p13 = por %p1201_p12, %p1200_p11 }
 0x530   : > { %p1203_p0 = pnand %p1202_p13, %p1196_p8 }
 0x532   : > { %1206 = shalt.err (!%p1203_p0)
}
 0x533   : > { %1118 = dma.vmem_to_hbm [thread:$0]  (%p1338_p5), %s1447_s26, 128, %s1445_s14, %s915_s13  }
 0x534 PF: > { %p1124_p1 = scmp.ge.s32.totalorder %s1241_s12, 2  ;;  %s940_s16 = sand.u32 1, %s1229_s30  }
 0x535   : > { %s941_s17 = scalar_lea.sflag [#allocation3], %s940_s16 }
 0x536   : > { %p1121_p2 = pnand %p1124_p1, %p1342_p6 }
 0x538   : > { %1224 = dma.done.wait (!%p1121_p2), %s941_s17, 128  }
 0x539   : > { %1226 = vsyncadd (!%p1121_p2), %s941_s17, 4294967168  ;;  %p19_p3 = scmp.ge.s32.totalorder %s1325_s15, 4   ;;  %s1500_s30 = smov %s1233_s10 }
 0x53a   : > { %s1501_s10 = smov %s1237_s11  ;;  %s1502_s11 = smov %s1336_s18 }
 0x53b   : > { %s1503_s12 = smov %s1325_s15  ;;  %21 = sbr.rel (!%p19_p3) target bundleno = 3 (0x3), region = 97 }
 0x542   :  { %946 = vsyncpa [#allocation3], 1 }
 0x543   :  { %948 = vsyncpa [#allocation3 + $0x1], 1 }

</bundles_post_ra>
